<compile_context>
chip_gen: v5e
topology: v5e:2x2
jax: 0.10.0
libtpu: 0.0.40
codegen_flags: <defaults>
</compile_context>

<pallas_src>
import jax
import jax.numpy as jnp
from jax.experimental import pallas as pl
from jax.experimental.pallas import tpu as pltpu


def mlp_kernel(x_ref, w1_ref, b1_ref, w2_ref, b2_ref, w3_ref, b3_ref,
               o_ref, emb_ref):
    # Lane-dense layout: columns = points.
    x = x_ref[...]                                    # (2, TN) f32

    # Embedder (include_input, 1 freq, [sin, cos]) assembled into one (6, TN)
    # VMEM slab via sublane-slice stores -> layer 1 is a single K=6 dot.
    # sin/cos computed in f32 (v5e EUP has no bf16).
    emb_ref[0:2, :] = x
    emb_ref[2:4, :] = jnp.sin(x)
    emb_ref[4:6, :] = jnp.cos(x)
    emb = emb_ref[...].astype(jnp.bfloat16)           # (6, TN) bf16

    # Layer 1: [H0,6]@[6,TN], bf16 operands, f32 accumulate; bias/ReLU in f32.
    h = jnp.dot(w1_ref[...], emb,
                preferred_element_type=jnp.float32) + b1_ref[...]
    h = jnp.maximum(h, 0.0)                           # (H0, TN) f32

    # Layer 2 + ReLU.
    h = jnp.dot(w2_ref[...], h.astype(jnp.bfloat16),
                preferred_element_type=jnp.float32) + b2_ref[...]
    h = jnp.maximum(h, 0.0)                           # (H1, TN) f32

    # Output layer + tanh.  [OUT,H1]@[H1,TN] -> lane-dense [OUT,TN] store.
    y = jnp.dot(w3_ref[...], h.astype(jnp.bfloat16),
                preferred_element_type=jnp.float32) + b3_ref[...]
    o_ref[...] = jnp.tanh(y).astype(o_ref.dtype)      # (OUT, TN)


def mlp_forward(x, params, *, tile_n=8192, x_transposed=False):
    """Fused MLP forward.

    x: [N, 2] f32 (PyTorch layout), or [2, N] if x_transposed=True
       (lane-dense fast path: avoids the host-side relayout HBM pass).
    params (PyTorch layout): w_i [out_features, in_features], b_i [out_features, 1].
    Returns (y [N, out_size], None).
    """
    assert tile_n % 128 == 0

    xt = x if x_transposed else x.T                   # [2, N] lane-dense
    in_dims, N = xt.shape
    assert in_dims == 2, "embedder expects 2-D input coordinates"

    w1, b1 = params["w1"], params["b1"]               # [H0, 6], [H0, 1]
    w2, b2 = params["w2"], params["b2"]               # [H1, H0], [H1, 1]
    w3, b3 = params["w3"], params["b3"]               # [OUT, H1], [OUT, 1]
    assert w1.shape[1] == 6, "in_size must be 6 (include_input + sin/cos, 1 freq)"
    out_size = w3.shape[0]

    # MXU operands in bf16 (accumulation stays f32 inside the kernel).
    w1b = w1.astype(jnp.bfloat16)
    w2b = w2.astype(jnp.bfloat16)
    w3b = w3.astype(jnp.bfloat16)
    b1f = b1.astype(jnp.float32)
    b2f = b2.astype(jnp.float32)
    b3f = b3.astype(jnp.float32)
    xt = xt.astype(jnp.float32)

    # Pad N only to a multiple of 128 (and only if needed); the last tile may
    # be partial and is handled by masked edge stores -- no pad-to-tile waste.
    n128 = pl.cdiv(N, 128) * 128
    if n128 != N:
        xt = jnp.pad(xt, ((0, 0), (0, n128 - N)))

    tile = min(tile_n, n128)
    grid = (pl.cdiv(n128, tile),)

    full = lambda a: pl.BlockSpec(a.shape, lambda i: (0, 0))

    yt = pl.pallas_call(
        mlp_kernel,
        out_shape=jax.ShapeDtypeStruct((out_size, n128), jnp.float32),
        grid_spec=pltpu.PrefetchScalarGridSpec(
            num_scalar_prefetch=0,
            grid=grid,
            in_specs=[
                pl.BlockSpec((2, tile), lambda i: (0, i)),   # x tile (lane-dense)
                full(w1b), full(b1f),                        # resident weights
                full(w2b), full(b2f),
                full(w3b), full(b3f),
            ],
            out_specs=pl.BlockSpec((out_size, tile), lambda i: (0, i)),
            scratch_shapes=[pltpu.VMEM((6, tile), jnp.float32)],  # embedding slab
        ),
        compiler_params=pltpu.CompilerParams(
            dimension_semantics=("parallel",),
            vmem_limit_bytes=32 * 1024 * 1024),
    )(xt, w1b, b1f, w2b, b2f, w3b, b3f)

    if out_size == 1:
        y = yt.reshape(n128, 1)[:N]                   # free relayout
    else:
        y = yt.T[:N]                                  # real transpose only if OUT > 1
    return y, None


def init_params(key, in_size, hidden_neurons, out_size):
    """Deterministic PyTorch-style uniform init; PyTorch layout [out, in] / [out, 1]."""
    dims = [in_size] + list(hidden_neurons) + [out_size]
    params = {}
    for idx in range(len(dims) - 1):
        fan_in, fan_out = dims[idx], dims[idx + 1]
        key, kw, kb = jax.random.split(key, 3)
        bound = 1.0 / (fan_in ** 0.5)
        params[f"w{idx + 1}"] = jax.random.uniform(
            kw, (fan_out, fan_in), jnp.float32, -bound, bound)
        params[f"b{idx + 1}"] = jax.random.uniform(
            kb, (fan_out, 1), jnp.float32, -bound, bound)
    return params


if __name__ == "__main__":
    # Small shapes consistent with the module: 2-D coords, embedder -> 6 features,
    # hidden_neurons=[32, 32], out_size=1.  N deliberately NOT a multiple of 128
    # to exercise the masked-tail path.
    N = 200
    hidden_neurons = [32, 32]
    out_size = 1
    in_size = 2 + 2 * 2 * 1   # include_input (2) + sin/cos (2 fns * 2 dims * 1 freq)

    key = jax.random.PRNGKey(0)
    key, kx = jax.random.split(key)
    x = jax.random.uniform(kx, (N, 2), jnp.float32, -1.0, 1.0)

    params = init_params(key, in_size, hidden_neurons, out_size)

    y, aux = mlp_forward(x, params)
    jax.block_until_ready(y)

    # Lane-dense fast path (caller already holds x as [2, N]) must match.
    y_t, _ = mlp_forward(x.T, params, x_transposed=True)
    jax.block_until_ready(y_t)

    # Reference in plain f32 JAX (row-major, PyTorch-layout weights).
    emb = jnp.concatenate([x, jnp.sin(x), jnp.cos(x)], axis=-1)
    h = jnp.maximum(emb @ params["w1"].T + params["b1"].T, 0.0)
    h = jnp.maximum(h @ params["w2"].T + params["b2"].T, 0.0)
    y_ref = jnp.tanh(h @ params["w3"].T + params["b3"].T)

    assert aux is None
    assert y.shape == (N, out_size)
    # bf16 MXU operands (f32 accumulate) -> compare against f32 ref with a
    # bf16-rounding tolerance.
    assert jnp.max(jnp.abs(y - y_ref)) < 2e-2
    assert jnp.max(jnp.abs(y_t - y_ref)) < 2e-2

    print("KERNEL_OK")
</pallas_src>

<mosaic_0001>
module attributes {stable_mosaic.version = 11 : i64} {
  func.func @mlp_kernel(%arg0: i32, %arg1: memref<2x256xf32, #tpu.memory_space<vmem>>, %arg2: memref<32x6xbf16, #tpu.memory_space<vmem>>, %arg3: memref<32x1xf32, #tpu.memory_space<vmem>>, %arg4: memref<32x32xbf16, #tpu.memory_space<vmem>>, %arg5: memref<32x1xf32, #tpu.memory_space<vmem>>, %arg6: memref<1x32xbf16, #tpu.memory_space<vmem>>, %arg7: memref<1x1xf32, #tpu.memory_space<vmem>>, %arg8: memref<1x256xf32, #tpu.memory_space<vmem>>, %arg9: memref<6x256xf32, #tpu.memory_space<vmem>>) attributes {dimension_semantics = [#tpu.dimension_semantics<parallel>], iteration_bounds = array<i64: 1>, scalar_prefetch = 0 : i64, scratch_operands = 1 : i64, tpu.core_type = #tpu.core_type<tc>, window_params = [{transform_indices = @transform_0, window_bounds = array<i64: 2, 256>}, {pipeline_mode = #tpu.pipeline_mode<synchronous>, transform_indices = @transform_1, window_bounds = array<i64: 32, 6>}, {pipeline_mode = #tpu.pipeline_mode<synchronous>, transform_indices = @transform_2, window_bounds = array<i64: 32, 1>}, {pipeline_mode = #tpu.pipeline_mode<synchronous>, transform_indices = @transform_3, window_bounds = array<i64: 32, 32>}, {pipeline_mode = #tpu.pipeline_mode<synchronous>, transform_indices = @transform_4, window_bounds = array<i64: 32, 1>}, {pipeline_mode = #tpu.pipeline_mode<synchronous>, transform_indices = @transform_5, window_bounds = array<i64: 1, 32>}, {pipeline_mode = #tpu.pipeline_mode<synchronous>, transform_indices = @transform_6, window_bounds = array<i64: 1, 1>}, {transform_indices = @transform_7, window_bounds = array<i64: 1, 256>}]} {
    %c0 = arith.constant 0 : index
    %c0_0 = arith.constant 0 : index
    %0 = vector.load %arg1[%c0, %c0_0] : memref<2x256xf32, #tpu.memory_space<vmem>>, vector<2x256xf32>
    %c0_1 = arith.constant 0 : index
    %c0_2 = arith.constant 0 : index
    %1 = vector.load %arg9[%c0_1, %c0_2] : memref<6x256xf32, #tpu.memory_space<vmem>>, vector<2x256xf32>
    tpu.vector_store %arg9[%c0_1, %c0_2], %0 {strides = array<i32>} : memref<6x256xf32, #tpu.memory_space<vmem>>, vector<2x256xf32>,
    %2 = math.sin %0 : vector<2x256xf32>
    %c2 = arith.constant 2 : index
    %c0_3 = arith.constant 0 : index
    %3 = vector.load %arg9[%c2, %c0_3] : memref<6x256xf32, #tpu.memory_space<vmem>>, vector<2x256xf32>
    tpu.vector_store %arg9[%c2, %c0_3], %2 {strides = array<i32>} : memref<6x256xf32, #tpu.memory_space<vmem>>, vector<2x256xf32>,
    %4 = math.cos %0 : vector<2x256xf32>
    %c4 = arith.constant 4 : index
    %c0_4 = arith.constant 0 : index
    %5 = vector.load %arg9[%c4, %c0_4] : memref<6x256xf32, #tpu.memory_space<vmem>>, vector<2x256xf32>
    tpu.vector_store %arg9[%c4, %c0_4], %4 {strides = array<i32>} : memref<6x256xf32, #tpu.memory_space<vmem>>, vector<2x256xf32>,
    %c0_5 = arith.constant 0 : index
    %c0_6 = arith.constant 0 : index
    %6 = vector.load %arg9[%c0_5, %c0_6] : memref<6x256xf32, #tpu.memory_space<vmem>>, vector<6x256xf32>
    %7 = arith.truncf %6 : vector<6x256xf32> to vector<6x256xbf16>
    %c0_7 = arith.constant 0 : index
    %c0_8 = arith.constant 0 : index
    %8 = vector.load %arg2[%c0_7, %c0_8] : memref<32x6xbf16, #tpu.memory_space<vmem>>, vector<32x6xbf16>
    %cst = arith.constant dense<0.000000e+00> : vector<32x256xf32>
    %9 = tpu.matmul %8, %7, %cst {dimension_numbers = #tpu.dot_dimension_numbers<[1], [0], [0], [1], [0, 0, 1, 1], [], []>} : vector<32x6xbf16>, vector<6x256xbf16>, vector<32x256xf32> -> vector<32x256xf32>
    %c0_9 = arith.constant 0 : index
    %c0_10 = arith.constant 0 : index
    %10 = vector.load %arg3[%c0_9, %c0_10] : memref<32x1xf32, #tpu.memory_space<vmem>>, vector<32x1xf32>
    %11 = vector.broadcast %10 : vector<32x1xf32> to vector<32x256xf32>
    %12 = arith.addf %9, %11 : vector<32x256xf32>
    %cst_11 = arith.constant 0.000000e+00 : f32
    %13 = vector.broadcast %cst_11 : f32 to vector<32x256xf32>
    %14 = arith.maximumf %12, %13 : vector<32x256xf32>
    %c0_12 = arith.constant 0 : index
    %c0_13 = arith.constant 0 : index
    %15 = vector.load %arg4[%c0_12, %c0_13] : memref<32x32xbf16, #tpu.memory_space<vmem>>, vector<32x32xbf16>
    %16 = arith.truncf %14 : vector<32x256xf32> to vector<32x256xbf16>
    %cst_14 = arith.constant dense<0.000000e+00> : vector<32x256xf32>
    %17 = tpu.matmul %15, %16, %cst_14 {dimension_numbers = #tpu.dot_dimension_numbers<[1], [0], [0], [1], [0, 0, 1, 1], [], []>} : vector<32x32xbf16>, vector<32x256xbf16>, vector<32x256xf32> -> vector<32x256xf32>
    %c0_15 = arith.constant 0 : index
    %c0_16 = arith.constant 0 : index
    %18 = vector.load %arg5[%c0_15, %c0_16] : memref<32x1xf32, #tpu.memory_space<vmem>>, vector<32x1xf32>
    %19 = vector.broadcast %18 : vector<32x1xf32> to vector<32x256xf32>
    %20 = arith.addf %17, %19 : vector<32x256xf32>
    %cst_17 = arith.constant 0.000000e+00 : f32
    %21 = vector.broadcast %cst_17 : f32 to vector<32x256xf32>
    %22 = arith.maximumf %20, %21 : vector<32x256xf32>
    %c0_18 = arith.constant 0 : index
    %c0_19 = arith.constant 0 : index
    %23 = vector.load %arg6[%c0_18, %c0_19] : memref<1x32xbf16, #tpu.memory_space<vmem>>, vector<1x32xbf16>
    %24 = arith.truncf %22 : vector<32x256xf32> to vector<32x256xbf16>
    %cst_20 = arith.constant dense<0.000000e+00> : vector<1x256xf32>
    %25 = tpu.matmul %23, %24, %cst_20 {dimension_numbers = #tpu.dot_dimension_numbers<[1], [0], [0], [1], [0, 0, 1, 1], [], []>} : vector<1x32xbf16>, vector<32x256xbf16>, vector<1x256xf32> -> vector<1x256xf32>
    %c0_21 = arith.constant 0 : index
    %c0_22 = arith.constant 0 : index
    %26 = vector.load %arg7[%c0_21, %c0_22] : memref<1x1xf32, #tpu.memory_space<vmem>>, vector<1x1xf32>
    %27 = vector.broadcast %26 : vector<1x1xf32> to vector<1x256xf32>
    %28 = arith.addf %25, %27 : vector<1x256xf32>
    %29 = math.tanh %28 : vector<1x256xf32>
    %c0_23 = arith.constant 0 : index
    %c0_24 = arith.constant 0 : index
    %30 = vector.load %arg8[%c0_23, %c0_24] : memref<1x256xf32, #tpu.memory_space<vmem>>, vector<1x256xf32>
    tpu.vector_store %arg8[%c0_23, %c0_24], %29 {strides = array<i32>} : memref<1x256xf32, #tpu.memory_space<vmem>>, vector<1x256xf32>,
    return
  }
  func.func @transform_0(%arg0: i32) -> (i32, i32) {
    %c0_i32 = arith.constant 0 : i32
    %c0_i32_0 = arith.constant 0 : i32
    return %c0_i32, %arg0 : i32, i32
  }
  func.func @transform_1(%arg0: i32) -> (i32, i32) {
    %c0_i32 = arith.constant 0 : i32
    %c0_i32_0 = arith.constant 0 : i32
    %c0_i32_1 = arith.constant 0 : i32
    return %c0_i32, %c0_i32_0 : i32, i32
  }
  func.func @transform_2(%arg0: i32) -> (i32, i32) {
    %c0_i32 = arith.constant 0 : i32
    %c0_i32_0 = arith.constant 0 : i32
    %c0_i32_1 = arith.constant 0 : i32
    return %c0_i32, %c0_i32_0 : i32, i32
  }
  func.func @transform_3(%arg0: i32) -> (i32, i32) {
    %c0_i32 = arith.constant 0 : i32
    %c0_i32_0 = arith.constant 0 : i32
    %c0_i32_1 = arith.constant 0 : i32
    return %c0_i32, %c0_i32_0 : i32, i32
  }
  func.func @transform_4(%arg0: i32) -> (i32, i32) {
    %c0_i32 = arith.constant 0 : i32
    %c0_i32_0 = arith.constant 0 : i32
    %c0_i32_1 = arith.constant 0 : i32
    return %c0_i32, %c0_i32_0 : i32, i32
  }
  func.func @transform_5(%arg0: i32) -> (i32, i32) {
    %c0_i32 = arith.constant 0 : i32
    %c0_i32_0 = arith.constant 0 : i32
    %c0_i32_1 = arith.constant 0 : i32
    return %c0_i32, %c0_i32_0 : i32, i32
  }
  func.func @transform_6(%arg0: i32) -> (i32, i32) {
    %c0_i32 = arith.constant 0 : i32
    %c0_i32_0 = arith.constant 0 : i32
    %c0_i32_1 = arith.constant 0 : i32
    return %c0_i32, %c0_i32_0 : i32, i32
  }
  func.func @transform_7(%arg0: i32) -> (i32, i32) {
    %c0_i32 = arith.constant 0 : i32
    %c0_i32_0 = arith.constant 0 : i32
    return %c0_i32, %arg0 : i32, i32
  }
}

</mosaic_0001>

<bundles_post_ra>
// kernel: tpu_custom_call.1
= control target key start
LH: loop header
LB: loop body
LE: loop exit
PB: predicated region body
PF: predicated region fallthrough
CT: control target
= control target key end

     0   :  { %s866_s0 = inlined_call_operand.vmem [shape: f32[2,256], index: 0, kind: input, shape index: {}]   ;;  %s867_s1 = inlined_call_operand.vmem [shape: bf16[32,6], index: 1, kind: input, shape index: {}]   ;;  %s868_s2 = inlined_call_operand.vmem [shape: f32[32,1], index: 2, kind: input, shape index: {}]   ;;  %s869_s3 = inlined_call_operand.vmem [shape: bf16[32,32], index: 3, kind: input, shape index: {}]   ;;  %s870_s4 = inlined_call_operand.vmem [shape: f32[32,1], index: 4, kind: input, shape index: {}]   ;;  %s871_s5 = inlined_call_operand.vmem [shape: bf16[1,32], index: 5, kind: input, shape index: {}]   ;;  %s872_s6 = inlined_call_operand.<no memory space> [shape: f32[1,1], index: 6, kind: input, shape index: {}]   ;;  %s873_s7 = inlined_call_operand.hbm [shape: f32[1,256], index: 7, kind: output, shape index: {}]  }
   0x1   :  { %v12_v0 = vstv %s872_s6 }
   0x2   :  { %13 = vst [vmem:[#allocation3] sm:$0x1] %v12_v0 }
   0x3   :  { %v764_v1 = vld [vmem:[%s866_s0] sm:$0xf]  ;;  %v710_v5 = vmov 0  }
   0x4   :  { %32 = vst [vmem:[#allocation1] ss:$4 sm:$0xff] %v764_v1  ;;  %v42_v2 = vand.u32 2139095040, %v764_v1  ;;  %v39_v4 = vand.u32 2147483647, %v764_v1  ;;  %678 = vset.pattern.permute.xlu1 %v710_v5  ;;  %677 = vset.pattern.permute.xlu0 %v710_v5 }
   0x6   :  { %v43_v3 = vshrl.u32 %v42_v2, 23 }
   0x7   :  { %14 = vsyncpa [#allocation5], 0  ;;  %679 = vset.pattern.permute.xlu2 %v710_v5  ;;  %v46_v9 = vand.u32 8388607, %v39_v4  ;;  %v711_v16 = vmov 683565275  }
   0x8   :  { %v633_v6 = vadd.s32 4294967169, %v43_v3  ;;  %v712_v18 = vmov 2475754826   ;;  %v713_v20 = vmov 2131351028   ;;  %vm41_vm12 = vcmp.lt.s32.totalorder %v764_v1, 0 }
   0x9   :  { %v47_v13 = vor.u32 8388608, %v46_v9  ;;  %v714_v22 = vmov 2102212464   ;;  %v715_v24 = vmov 920167782   ;;  %s717_s25 = smov [#allocation4]  }
   0xa   :  { %v49_v7 = vadd.s32 1, %v633_v6  ;;  %v716_v30 = vmov 1326507024   ;;  %vm40_vm13 = vcmp.le.f32.partialorder %v39_v4, 0.7853982  ;;  %s622_s26 = sshll.u32 %s717_s25, 4  ;;  %s623_s26 = int_to_ptr.vmem [resolvable:$true] %s622_s26 }
   0xb   :  { %v33_v8 = vld.sshfl [vmem:[#allocation1] sm:$0xff pattern:$0x73625140]  ;;  %v34_v10 = vld.sshfl [vmem:[#allocation1 + $0x8] sm:$0xff pattern:$0x73625140] }
   0xc   :  { %37 = vst [vmem:[#allocation2] sm:$0x3] %v33_v8  ;;  %vm50_vm0 = vcmp.gt.s32.totalorder %v49_v7, 0  ;;  %v777_v32 = vshll.u32 %v47_v13, 8  ;;  %s624_s0 = sshll.u32 %s873_s7, 4  ;;  %s625_s0 = int_to_ptr.hbm [resolvable:$true] %s624_s0 }
   0xd   :  { %v51_v11 = vsel %vm50_vm0, %v49_v7, 0  ;;  %38 = vst [vmem:[#allocation2 + $0x8] sm:$0x3] %v34_v10 }
   0xe   :  { %v53_v12 = vand.u32 31, %v51_v11  ;;  %v774_v14 = vshrl.u32 %v51_v11, 5  ;;  %v88_v44 = vand.u32 65535, %v777_v32  ;;  %v89_v45 = vshrl.u32 %v777_v32, 16 }
  0x10   :  { %v54_v15 = vsub.s32 32, %v53_v12  ;;  %v56_v17 = vshll.u32 %v711_v16, %v53_v12  ;;  %v59_v19 = vshll.u32 %v712_v18, %v53_v12  ;;  %v62_v21 = vshll.u32 %v713_v20, %v53_v12 }
  0x11   :  { %v65_v23 = vshll.u32 %v714_v22, %v53_v12  ;;  %v68_v25 = vshll.u32 %v715_v24, %v53_v12  ;;  %vm71_vm1 = vcmp.lt.s32.totalorder %v774_v14, 1  ;;  %vm74_vm2 = vcmp.lt.s32.totalorder %v774_v14, 4 }
  0x12   :  { %v57_v26 = vshrl.u32 %v712_v18, %v54_v15  ;;  %v60_v27 = vshrl.u32 %v713_v20, %v54_v15  ;;  %v63_v28 = vshrl.u32 %v714_v22, %v54_v15  ;;  %v66_v29 = vshrl.u32 %v715_v24, %v54_v15 }
  0x13   :  { %v69_v31 = vshrl.u32 %v716_v30, %v54_v15  ;;  %vm73_vm3 = vcmp.lt.s32.totalorder %v774_v14, 3  ;;  %vm72_vm4 = vcmp.lt.s32.totalorder %v774_v14, 2  ;;  %v55_v52 = vshrl.u32 %v711_v16, %v54_v15 }
  0x14   :  { %v58_v33 = vor.u32 %v57_v26, %v56_v17  ;;  %v61_v34 = vor.u32 %v60_v27, %v59_v19  ;;  %v64_v35 = vor.u32 %v63_v28, %v62_v21  ;;  %v67_v36 = vor.u32 %v66_v29, %v65_v23 }
  0x15   :  { %v70_v37 = vor.u32 %v69_v31, %v68_v25 }
  0x16   :  { %v79_v38 = vsel %vm71_vm1, %v58_v33, %v61_v34  ;;  %v83_v39 = vsel %vm71_vm1, %v61_v34, %v64_v35  ;;  %v80_v40 = vsel %vm74_vm2, %v67_v36, 920167782  ;;  %v75_v2 = vsel %vm71_vm1, %v55_v52, %v58_v33 }
  0x17   :  { %v84_v41 = vsel %vm74_vm2, %v70_v37, 1326507024  ;;  %v81_v42 = vsel %vm73_vm3, %v64_v35, %v80_v40  ;;  %v76_v6 = vsel %vm74_vm2, %v64_v35, 2102212464  ;;  %vm182_vm1 = vweird.f32 %v764_v1 }
  0x18   :  { %v85_v43 = vsel %vm73_vm3, %v67_v36, %v84_v41  ;;  %v82_v46 = vsel %vm72_vm4, %v79_v38, %v81_v42  ;;  %v77_v16 = vsel %vm73_vm3, %v61_v34, %v76_v6 }
  0x19   :  { %v86_v47 = vsel %vm72_vm4, %v83_v39, %v85_v43  ;;  %v112_v50 = vand.u32 65535, %v82_v46  ;;  %v113_v51 = vshrl.u32 %v82_v46, 16  ;;  %v78_v24 = vsel %vm72_vm4, %v75_v2, %v77_v16 }
  0x1a   :  { %v90_v48 = vand.u32 65535, %v86_v47  ;;  %v91_v49 = vshrl.u32 %v86_v47, 16  ;;  %v132_v28 = vmul.u32 %v777_v32, %v78_v24 }
  0x1b   :  { %v114_v56 = vmul.u32 %v112_v50, %v88_v44  ;;  %v115_v57 = vmul.u32 %v113_v51, %v88_v44  ;;  %v116_v58 = vmul.u32 %v112_v50, %v89_v45  ;;  %v117_v62 = vmul.u32 %v113_v51, %v89_v45 }
  0x1c   :  { %v92_v53 = vmul.u32 %v90_v48, %v88_v44  ;;  %v93_v54 = vmul.u32 %v91_v49, %v88_v44  ;;  %v94_v55 = vmul.u32 %v90_v48, %v89_v45  ;;  %v95_v59 = vmul.u32 %v91_v49, %v89_v45 }
  0x1d   :  { %v118_v63 = vshll.u32 %v115_v57, 16  ;;  %v120_v0 = vshll.u32 %v116_v58, 16  ;;  %v119_v13 = vshrl.u32 %v115_v57, 16  ;;  %v121_v20 = vshrl.u32 %v116_v58, 16 }
  0x1e   :  { %v96_v60 = vshll.u32 %v93_v54, 16  ;;  %v98_v61 = vshll.u32 %v94_v55, 16  ;;  %v97_v9 = vshrl.u32 %v93_v54, 16  ;;  %v99_v17 = vshrl.u32 %v94_v55, 16 }
  0x1f   :  { %vm122_vm6 = vc.u32 %v114_v56, %v118_v63  ;;  %v124_v8 = vadd.s32 %v118_v63, %v114_v56 }
  0x20   :  { %vm100_vm5 = vc.u32 %v92_v53, %v96_v60  ;;  %v102_v3 = vadd.s32 %v96_v60, %v92_v53  ;;  %v123_v11 = vsel %vm122_vm6, 1, %v710_v5  ;;  %vm408_vm6 = vcmask 48128  }
  0x21   :  { %v101_v7 = vsel %vm100_vm5, 1, %v710_v5  ;;  %v125_v15 = vadd.s32 %v123_v11, %v117_v62  ;;  %vm126_vm8 = vc.u32 %v124_v8, %v120_v0  ;;  %v128_v23 = vadd.s32 %v124_v8, %v120_v0 }
  0x22   :  { %v103_v10 = vadd.s32 %v101_v7, %v95_v59  ;;  %vm104_vm7 = vc.u32 %v102_v3, %v98_v61  ;;  %v127_v19 = vsel %vm126_vm8, 1, %v710_v5  ;;  %vm415_vm5 = vcmask 1042432  }
  0x23   :  { %v105_v12 = vsel %vm104_vm7, 1, %v710_v5  ;;  %v129_v21 = vadd.s32 %v127_v19, %v125_v15  ;;  %vm510_vm7 = vcmask 261120   ;;  %vm609_vm8 = vcmask 1040384  }
  0x24   :  { %v107_v18 = vadd.s32 %v105_v12, %v103_v10 }
  0x25   :  { %v130_v25 = vadd.s32 %v129_v21, %v119_v13  ;;  %v374_v21 = vld [vmem:[%s868_s2] sm:$0xff] }
  0x26   :  { %v108_v22 = vadd.s32 %v107_v18, %v97_v9  ;;  %380 = vperm.xlu1 %678, %v374_v21  }
  0x27   :  { %v131_v27 = vadd.s32 %v130_v25, %v121_v20 }
  0x28   :  { %v109_v26 = vadd.s32 %v108_v22, %v99_v17  ;;  %v376_v22 = vld [vmem:[%s868_s2 + $0x10] sm:$0xff] }
  0x29   :  { %v135_v29 = vadd.s32 1, %v131_v27  ;;  %390 = vperm.xlu0 %677, %v376_v22  }
  0x2a   :  { %vm134_vm9 = vc.u32 %v109_v26, %v128_v23  ;;  %v133_v14 = vadd.s32 %v128_v23, %v109_v26 }
  0x2b   :  { %v136_v30 = vsel %vm134_vm9, %v135_v29, %v131_v27  ;;  %v377_v29 = vld [vmem:[%s868_s2 + $0x18] sm:$0xff] }
  0x2c   :  { %v137_v31 = vadd.s32 %v136_v30, %v132_v28  ;;  %v375_v28 = vld [vmem:[%s868_s2 + $0x8] sm:$0xff]  ;;  %v476_v30 = vld [vmem:[%s870_s4] sm:$0xff] }
  0x2e   :  { %v138_v33 = vadd.s32 536870912, %v137_v31  ;;  %385 = vperm.xlu1 %678, %v375_v28  }
  0x30   :  { %v139_v34 = vshrl.u32 %v138_v33, 30 }
  0x31   :  { %395 = vperm.xlu0 %677, %v377_v29  }
  0x32   :  { %v140_v35 = vshll.u32 %v139_v34, 30  ;;  %v163_v51 = vsub.s32 4, %v139_v34 }
  0x34   :  { %v141_v5 = vsub.s32 %v137_v31, %v140_v35  ;;  %v164_v54 = vsel %vm41_vm12, %v163_v51, %v139_v34  ;;  %v477_v31 = vld [vmem:[%s870_s4 + $0x8] sm:$0xff] }
  0x35   :  { %v166_v57 = vsel %vm40_vm13, 0, %v164_v54 }
  0x36   :  { %vm142_vm10 = vcmp.lt.s32.totalorder %v141_v5, 0  ;;  %v143_v36 = vsub.s32 0, %v141_v5  ;;  %v183_v62 = vadd.s32 3, %v166_v57  ;;  %v347_v12 = vand.u32 3, %v166_v57  ;;  %487 = vperm.xlu1 %678, %v477_v31  }
  0x38   :  { %v144_v37 = vsel %vm142_vm10, %v143_v36, %v141_v5  ;;  %v184_v6 = vand.u32 3, %v183_v62  ;;  %vm349_vm2 = vcmp.eq.s32.totalorder %v347_v12, 0  ;;  %vm352_vm3 = vcmp.eq.s32.totalorder %v347_v12, 2 }
  0x39   :  { %v145_v38 = vclz %v144_v37  ;;  %vm348_vm4 = vcmp.lt.s32.totalorder %v347_v12, 2  ;;  %482 = vperm.xlu0 %677, %v476_v30   ;;  %v665_v37 = vld [vmem:[%s867_s1] sm:$0xff]  ;;  %v668_v12 = vld [vmem:[%s869_s3 + $0x8] sm:$0xff] }
  0x3a   :  { %vm189_vm14 = vcmp.eq.s32.totalorder %v184_v6, 2  ;;  %vm186_vm15 = vcmp.eq.s32.totalorder %v184_v6, 0  ;;  %vm185_vm0 = vcmp.lt.s32.totalorder %v184_v6, 2 }
  0x3b   :  { %v634_v39 = vadd.s32 4294967294, %v145_v38 }
  0x3d   :  { %vm635_vm11 = vcmp.lt.s32.totalorder %v634_v39, 0 }
  0x3e   :  { %v148_v40 = vsel %vm635_vm11, 0, %v634_v39  ;;  %v666_v39 = vld [vmem:[%s867_s1 + $0x8] sm:$0xff] }
  0x3f   :  { %v149_v41 = vsub.s32 32, %v148_v40  ;;  %v150_v42 = vshll.u32 %v141_v5, %v148_v40  ;;  %v153_v43 = vsub.s32 4294967266, %v148_v40 }
  0x41   :  { %v151_v32 = vshrl.u32 %v133_v14, %v149_v41  ;;  %v154_v44 = vadd.s32 127, %v153_v43 }
  0x43   :  { %v152_v45 = vor.u32 %v151_v32, %v150_v42  ;;  %v155_v46 = vshll.u32 %v154_v44, 23 }
  0x45   :  { %v156_v47 = vor.u32 4788187, %v155_v46  ;;  %v159_v48 = vcvt.s32.f32 %v152_v45 }
  0x47   :  { %v157_v49 = vand.u32 2147483647, %v156_v47 }
  0x49   :  { %v160_v50 = vmul.f32 %v159_v48, %v157_v49  ;;  %v478_v48 = vld [vmem:[%s870_s4 + $0x10] sm:$0xff] }
  0x4a   :  { %492 = vperm.xlu2 %679, %v478_v48  }
  0x4b   :  { %v161_v52 = vxor.u32 2147483648, %v160_v50 }
  0x4d   :  { %v162_v53 = vsel %vm41_vm12, %v161_v52, %v160_v50 }
  0x4e   :  { %v165_v55 = vsel %vm40_vm13, %v764_v1, %v162_v53 }
  0x4f   :  { %v167_v56 = vmul.f32 %v165_v55, %v165_v55 }
  0x51   :  { %v168_v58 = vmul.f32 -0.001358992, %v167_v56  ;;  %v175_v59 = vmul.f32 -0.00019511016, %v167_v56 }
  0x53   :  { %v169_v60 = vadd.f32 0.041655596, %v168_v58  ;;  %v176_v61 = vadd.f32 0.008332121, %v175_v59 }
  0x55   :  { %v170_v63 = vmul.f32 %v169_v60, %v167_v56  ;;  %v177_v0 = vmul.f32 %v176_v61, %v167_v56 }
  0x57   :  { %v171_v2 = vadd.f32 -0.4999988, %v170_v63  ;;  %v178_v3 = vadd.f32 -0.16666654, %v177_v0 }
  0x59   :  { %v172_v7 = vmul.f32 %v171_v2, %v167_v56  ;;  %v179_v8 = vmul.f32 %v178_v3, %v167_v56  ;;  %v479_v2 = vld [vmem:[%s870_s4 + $0x18] sm:$0xff] }
  0x5a   :  { %497 = vperm.xlu2 %679, %v479_v2  }
  0x5b   :  { %v173_v4 = vadd.f32 1.0, %v172_v7  ;;  %v180_v9 = vadd.f32 1.0, %v179_v8 }
  0x5d   :  { %v181_v10 = vmul.f32 %v180_v9, %v165_v55  ;;  %v190_v11 = vxor.u32 2147483648, %v173_v4 }
  0x5f   :  { %v187_v13 = vxor.u32 2147483648, %v181_v10  ;;  %v191_v15 = vsel %vm189_vm14, %v190_v11, %v181_v10  ;;  %v354_v20 = vsel %vm352_vm3, %v190_v11, %v181_v10  ;;  %v667_v10 = vld [vmem:[%s869_s3] sm:$0xff]  ;;  %v568_v11 = vld [vmem:[#allocation3] sm:$0x1] }
  0x61   :  { %v188_v16 = vsel %vm186_vm15, %v173_v4, %v187_v13  ;;  %v351_v19 = vsel %vm349_vm2, %v173_v4, %v187_v13 }
  0x62   :  { %v192_v17 = vsel %vm185_vm0, %v188_v16, %v191_v15  ;;  %v355_v1 = vsel %vm348_vm4, %v351_v19, %v354_v20  ;;  %571 = vperm.xlu2 %679, %v568_v11  }
  0x63   :  { %v193_v18 = vsel %vm182_vm1, nan, %v192_v17  ;;  %v356_v23 = vsel %vm182_vm1, nan, %v355_v1 }
  0x64   :  { %196 = vst [vmem:[#allocation1 + $0x1] ss:$4 sm:$0xff] %v193_v18 }
  0x6b   :  { %v197_v24 = vld.sshfl [vmem:[#allocation1] sm:$0xff pattern:$0x73625140]  ;;  %v198_v25 = vld.sshfl [vmem:[#allocation1 + $0x8] sm:$0xff pattern:$0x73625140] }
  0x6c   :  { %201 = vst [vmem:[#allocation2] sm:$0xc] %v197_v24 }
  0x6d   :  { %359 = vst [vmem:[#allocation1 + $0x2] ss:$4 sm:$0xff] %v356_v23 }
  0x6e   :  { %202 = vst [vmem:[#allocation2 + $0x8] sm:$0xc] %v198_v25 }
  0x74   :  { %v360_v26 = vld.sshfl [vmem:[#allocation1] sm:$0xff pattern:$0x73625140]  ;;  %v361_v27 = vld.sshfl [vmem:[#allocation1 + $0x8] sm:$0xff pattern:$0x73625140] }
  0x75   :  { %364 = vst [vmem:[#allocation2] sm:$0x30] %v360_v26 }
  0x76   :  { %365 = vst [vmem:[#allocation2 + $0x8] sm:$0x30] %v361_v27 }
  0x7c   :  { %v366_v33 = vld [vmem:[#allocation2] sm:$0x3f] }
  0x7d   :  { %v368_v34 = vpack.c.bf16 %v366_v33, %v366_v33  ;;  %v367_v35 = vld [vmem:[#allocation2 + $0x8] sm:$0x3f] }
  0x7e   :  { %v369_v5 = vpack.c.bf16 %v367_v35, %v367_v35 }
  0x7f   :  { %v417_v36 = vsel %vm415_vm5, %v368_v34, 0 }
  0x80   :  { %429 = vmatpush.bf16.msra.mxu0 %v417_v36  ;;  %v420_v38 = vsel %vm415_vm5, %v369_v5, 0 }
  0x81   :  { %448 = vmatpush.bf16.msra.mxu1 %v420_v38 }
  0x83   :  { %647 = vmatmul.msk.bf16.vlgmr.msra.gmra.mxu0 %vm408_vm6, %v665_v37 }
  0x84   :  { %649 = vmatmul.msk.bf16.vlgmr.msra.gmra.mxu1 %vm408_vm6, %v665_v37 }
  0x93   :  { %648 = vmatmul.msk.bf16.gmra.mxu0 %vm408_vm6, %v666_v39 }
  0x94   :  { %650 = vmatmul.msk.bf16.gmra.mxu1 %vm408_vm6, %v666_v39 }
  0x98   :  { %v381_v43 = vpop.permute.xlu1 %380 }
  0x9b   :  { %v391_v32 = vpop.permute.xlu0 %390 }
  0xa0   :  { %v386_v46 = vpop.permute.xlu1 %385 }
  0xa3   :  { %v396_v49 = vpop.permute.xlu0 %395 }
  0xa4   :  { %v493_v18 = vpop.permute.xlu2 %492 }
  0xa8   :  { %v488_v21 = vpop.permute.xlu1 %487 }
  0xab   :  { %v483_v28 = vpop.permute.xlu0 %482 }
  0xb4   :  { %v498_v1 = vpop.permute.xlu2 %497 }
 0x100   :  { %v431_v14 = vpop.f32.mrf.mxu0 }
 0x101   :  { %v450_v40 = vpop.f32.mrf.mxu1  ;;  %v432_v57 = vadd.f32 %v431_v14, %v381_v43 }
 0x102   :  { %v451_v60 = vadd.f32 %v450_v40, %v381_v43 }
 0x103   :  { %v460_v7 = vmax.f32 %v432_v57, 0.0 }
 0x104   :  { %v461_v8 = vmax.f32 %v451_v60, 0.0 }
 0x108   :  { %v433_v41 = vpop.f32.mrf.mxu0 }
 0x109   :  { %v452_v42 = vpop.f32.mrf.mxu1  ;;  %v434_v52 = vadd.f32 %v433_v41, %v386_v46 }
 0x10a   :  { %v453_v55 = vadd.f32 %v452_v42, %v386_v46 }
 0x10b   :  { %v462_v63 = vmax.f32 %v434_v52, 0.0 }
 0x10c   :  { %v463_v3 = vmax.f32 %v453_v55, 0.0 }
 0x10d   :  { %v472_v4 = vpack.c.bf16 %v462_v63, %v460_v7 }
 0x10e   :  { %v473_v9 = vpack.c.bf16 %v463_v3, %v461_v8 }
 0x110   :  { %v436_v44 = vpop.f32.mrf.mxu0 }
 0x111   :  { %v455_v45 = vpop.f32.mrf.mxu1  ;;  %v437_v47 = vadd.f32 %v436_v44, %v391_v32  ;;  %v572_v44 = vpop.permute.xlu2 %571 }
 0x112   :  { %v456_v50 = vadd.f32 %v455_v45, %v391_v32  ;;  %v563_v32 = vld [vmem:[%s871_s5] sm:$0x1]  ;;  %v574_v45 = vperm.slane %v572_v44, 0 }
 0x113   :  { %v464_v58 = vmax.f32 %v437_v47, 0.0 }
 0x114   :  { %v465_v61 = vmax.f32 %v456_v50, 0.0  ;;  %v612_v50 = vlaneseq }
 0x116   :  { %vm614_vm9 = vcmp.lt.s32.totalorder %v612_v50, 256 }
 0x118   :  { %v438_v51 = vpop.f32.mrf.mxu0 }
 0x119   :  { %v439_v53 = vadd.f32 %v438_v51, %v396_v49  ;;  %v457_v54 = vpop.f32.mrf.mxu1 }
 0x11a   :  { %v458_v56 = vadd.f32 %v457_v54, %v396_v49 }
 0x11b   :  { %v466_v59 = vmax.f32 %v439_v53, 0.0 }
 0x11c   :  { %v467_v62 = vmax.f32 %v458_v56, 0.0 }
 0x11d   :  { %v474_v0 = vpack.c.bf16 %v466_v59, %v464_v58 }
 0x11e   :  { %v475_v6 = vpack.c.bf16 %v467_v62, %v465_v61 }
 0x11f   :  { %523 = vmatpush.bf16.msra.mxu2 %v474_v0 }
 0x120   :  { %542 = vmatpush.bf16.msra.mxu3 %v475_v6 }
 0x123   :  { %524 = vmatpush.bf16.msra.mxu2 %v472_v4 }
 0x124   :  { %543 = vmatpush.bf16.msra.mxu3 %v473_v9 }
 0x126   :  { %659 = vmatmul.msk.bf16.vlgmr.msra.gmra.mxu2 %vm510_vm7, %v667_v10 }
 0x127   :  { %661 = vmatmul.msk.bf16.vlgmr.msra.gmra.mxu3 %vm510_vm7, %v667_v10 }
 0x136   :  { %660 = vmatmul.msk.bf16.gmra.mxu2 %vm510_vm7, %v668_v12 }
 0x137   :  { %662 = vmatmul.msk.bf16.gmra.mxu3 %vm510_vm7, %v668_v12 }
 0x1a9   :  { %v526_v13 = vpop.f32.mrf.mxu2 }
 0x1aa   :  { %v545_v15 = vpop.f32.mrf.mxu3  ;;  %v527_v31 = vadd.f32 %v526_v13, %v483_v28 }
 0x1ab   :  { %v546_v35 = vadd.f32 %v545_v15, %v483_v28 }
 0x1ac   :  { %v555_v40 = vmax.f32 %v527_v31, 0.0 }
 0x1ad   :  { %v556_v41 = vmax.f32 %v546_v35, 0.0 }
 0x1b1   :  { %v528_v16 = vpop.f32.mrf.mxu2 }
 0x1b2   :  { %v547_v17 = vpop.f32.mrf.mxu3  ;;  %v529_v25 = vadd.f32 %v528_v16, %v488_v21 }
 0x1b3   :  { %v548_v29 = vadd.f32 %v547_v17, %v488_v21 }
 0x1b4   :  { %v557_v37 = vmax.f32 %v529_v25, 0.0 }
 0x1b5   :  { %v558_v39 = vmax.f32 %v548_v29, 0.0 }
 0x1b6   :  { %v564_v42 = vpack.c.bf16 %v557_v37, %v555_v40 }
 0x1b7   :  { %v565_v43 = vpack.c.bf16 %v558_v39, %v556_v41 }
 0x1b9   :  { %v531_v19 = vpop.f32.mrf.mxu2 }
 0x1ba   :  { %v550_v20 = vpop.f32.mrf.mxu3  ;;  %v532_v22 = vadd.f32 %v531_v19, %v493_v18 }
 0x1bb   :  { %v551_v23 = vadd.f32 %v550_v20, %v493_v18 }
 0x1bc   :  { %v559_v33 = vmax.f32 %v532_v22, 0.0 }
 0x1bd   :  { %v560_v5 = vmax.f32 %v551_v23, 0.0 }
 0x1c1   :  { %v533_v24 = vpop.f32.mrf.mxu2 }
 0x1c2   :  { %v534_v26 = vadd.f32 %v533_v24, %v498_v1  ;;  %v552_v27 = vpop.f32.mrf.mxu3 }
 0x1c3   :  { %v553_v30 = vadd.f32 %v552_v27, %v498_v1 }
 0x1c4   :  { %v561_v34 = vmax.f32 %v534_v26, 0.0 }
 0x1c5   :  { %v562_v36 = vmax.f32 %v553_v30, 0.0 }
 0x1c6   :  { %v566_v38 = vpack.c.bf16 %v561_v34, %v559_v33 }
 0x1c7   :  { %v567_v14 = vpack.c.bf16 %v562_v36, %v560_v5 }
 0x1c8   :  { %584 = vmatpush.bf16.msrb.mxu0 %v566_v38 }
 0x1c9   :  { %597 = vmatpush.bf16.msrb.mxu1 %v567_v14 }
 0x1cc   :  { %585 = vmatpush.bf16.msrb.mxu0 %v564_v42 }
 0x1cd   :  { %598 = vmatpush.bf16.msrb.mxu1 %v565_v43 }
 0x1cf   :  { %663 = vmatmul.msk.bf16.vlgmr.msrb.gmra.mxu0 %vm510_vm7, %v563_v32 }
 0x1d0   :  { %664 = vmatmul.msk.bf16.vlgmr.msrb.gmra.mxu1 %vm510_vm7, %v563_v32 }
 0x24c   :  { %v587_v46 = vpop.f32.mrf.mxu0 }
 0x24d   :  { %v600_v47 = vpop.f32.mrf.mxu1  ;;  %v588_v48 = vadd.f32 %v587_v46, %v574_v45 }
 0x24e   :  { %v601_v49 = vadd.f32 %v600_v47, %v574_v45 }
 0x250   :  { %680 = vtanh.f32 %v601_v49 }
 0x251   :  { %682 = vtanh.f32 %v588_v48 }
 0x254   :  { %v589_v51 = vpop.f32.mrf.mxu0 }
 0x255   :  { %v602_v52 = vpop.f32.mrf.mxu1 }
 0x256   :  { %v681_v53 = vpop.eup %680 }
 0x257   :  { %v608_v54 = vrot.slane %v681_v53, 7  ;;  %v683_v55 = vpop.eup %682 }
 0x259   :  { %v610_v56 = vsel %vm609_vm8, %v683_v55, %v608_v54 }
 0x25a   :  { %616 = vst.msk [vmem:[#allocation4] sm:$0x3] %vm614_vm9, %v610_v56 }
 0x25b   :  { %627 = dma.vmem_to_hbm [thread:$0]  %s623_s26, 32, %s625_s0, [#allocation5]  }
 0x25c   :  { %708 = dma.done.wait [#allocation5], 32  }
 0x25d   :  { %709 = vsyncadd [#allocation5], 4294967264 }
 0x25e   :  { %632 = vsyncpa [#allocation5], 1 }

</bundles_post_ra>
